<compile_context>
chip_gen: v6e
topology: v6e:2x2x1
jax: 0.10.0
libtpu: 0.0.40
codegen_flags: <defaults>
</compile_context>

<pallas_src>
import functools

import jax
import jax.numpy as jnp
from jax import lax
from jax.experimental import pallas as pl
from jax.experimental.pallas import tpu as pltpu


def embed_kernel(x_ref, w_ref, o_ref, *, T, num_tables, V):
    """Single-invocation embedding lookup.

    x_ref: (B*T, 1) int32   -- row r = b*T + t holds index x[b, 0, t]
    w_ref: (num_tables*V, E) float32 -- stacked embedding tables
    o_ref: (B, E, T) float32 -- PyTorch output layout, written directly
    """
    idx = x_ref[...]                                    # (B*T, 1) int32
    BT = idx.shape[0]
    NV = w_ref.shape[0]                                 # num_tables * V

    if num_tables == 1:
        target = idx                                    # shared table: column = x
    else:
        # row r = b*T + t  ->  table id t = r % T; column = t*V + x
        r = lax.broadcasted_iota(jnp.int32, (BT, 1), 0)
        target = (r % T) * V + idx

    # One-hot over the stacked tables, then a single MXU matmul gathers every
    # (b, t) embedding row in one shot: gathered[b*T+t, e] = W_{t}[x[b,t], e].
    cols = lax.broadcasted_iota(jnp.int32, (BT, NV), 1)
    onehot = (target == cols).astype(w_ref.dtype)       # (B*T, num_tables*V)
    gathered = jnp.dot(onehot, w_ref[...],
                       preferred_element_type=jnp.float32)   # (B*T, E) f32

    # Write the PyTorch (B, E, T) layout directly: per-batch (T, E) -> (E, T)
    # transpose on the XLU (free slot), no wrapper-side transpose needed.
    B = o_ref.shape[0]
    for b in range(B):                                  # B is tiny & static
        blk = gathered[b * T:(b + 1) * T, :]            # (T, E)
        o_ref[b] = blk.T.astype(o_ref.dtype)            # (E, T)


def my_embedding_forward(x, tables, temporal_dim=None):
    """Pallas implementation of MyEmbedding.forward.

    x:      (B, 1, T) integer indices
    tables: (num_tables, V, E) float32 embedding weights
            num_tables == 1 if temporal_dim is None else temporal_dim
    returns (B, E, T) float32
    """
    B, one, T = x.shape
    assert one == 1
    num_tables, V, E = tables.shape
    if temporal_dim is None:
        assert num_tables == 1
    else:
        assert num_tables == T == temporal_dim

    # Free row-major reshapes (no data movement): (B,1,T)->(B*T,1), (nt,V,E)->(nt*V,E).
    x_flat = x.reshape(B * T, 1).astype(jnp.int32)
    w_flat = tables.reshape(num_tables * V, E)

    kernel = functools.partial(embed_kernel, T=T, num_tables=num_tables, V=V)

    out = pl.pallas_call(
        kernel,
        out_shape=jax.ShapeDtypeStruct((B, E, T), tables.dtype),
        grid=(1,),
        in_specs=[
            pl.BlockSpec((B * T, 1), lambda i: (0, 0)),            # all indices
            pl.BlockSpec((num_tables * V, E), lambda i: (0, 0)),   # all tables, resident
        ],
        out_specs=pl.BlockSpec((B, E, T), lambda i: (0, 0, 0)),
        compiler_params=pltpu.CompilerParams(
            dimension_semantics=("arbitrary",)),
    )(x_flat, w_flat)

    return out


def _ref_single(x, table):
    # table[x]: (B,1,T,E) -> permute (0,1,3,2) -> squeeze(1) -> (B,E,T)
    emb = table[x]
    return jnp.squeeze(jnp.transpose(emb, (0, 1, 3, 2)), axis=1)


def _ref_multi(x, tables):
    T = x.shape[-1]
    outs = [tables[i][x[:, 0, i]] for i in range(T)]   # each (B, E)
    return jnp.stack(outs, axis=-1)                    # (B, E, T)


if __name__ == "__main__":
    key = jax.random.PRNGKey(0)
    k1, k2, k3, k4 = jax.random.split(key, 4)

    B = 2          # batch
    V = 16         # nc_out (vocab size)
    E = 32         # nc_embedding

    # ---- case 1: temporal_dim=None (single shared embedding) ----
    T1 = 16
    table_single = jax.random.normal(k1, (1, V, E), dtype=jnp.float32)
    x1 = jax.random.randint(k2, (B, 1, T1), 0, V, dtype=jnp.int32)

    out1 = jax.block_until_ready(my_embedding_forward(x1, table_single, temporal_dim=None))
    ref1 = _ref_single(x1, table_single[0])
    assert out1.shape == (B, E, T1)
    assert jnp.allclose(out1, ref1, atol=1e-6), "single-embedding branch mismatch"

    # ---- case 2: temporal_dim=T (one embedding per time step) ----
    T2 = 8
    tables_multi = jax.random.normal(k3, (T2, V, E), dtype=jnp.float32)
    x2 = jax.random.randint(k4, (B, 1, T2), 0, V, dtype=jnp.int32)

    out2 = jax.block_until_ready(my_embedding_forward(x2, tables_multi, temporal_dim=T2))
    ref2 = _ref_multi(x2, tables_multi)
    assert out2.shape == (B, E, T2)
    assert jnp.allclose(out2, ref2, atol=1e-6), "multi-embedding branch mismatch"

    print("KERNEL_OK")
</pallas_src>

<mosaic_0001>
module attributes {stable_mosaic.version = 11 : i64} {
  func.func @embed_kernel(%arg0: i32, %arg1: memref<32x1xi32, #tpu.memory_space<vmem>>, %arg2: memref<16x32xf32, #tpu.memory_space<vmem>>, %arg3: memref<2x32x16xf32, #tpu.memory_space<vmem>>) attributes {dimension_semantics = [#tpu.dimension_semantics<arbitrary>], iteration_bounds = array<i64: 1>, scalar_prefetch = 0 : i64, scratch_operands = 0 : i64, tpu.core_type = #tpu.core_type<tc>, window_params = [{pipeline_mode = #tpu.pipeline_mode<synchronous>, transform_indices = @transform_0, window_bounds = array<i64: 32, 1>}, {pipeline_mode = #tpu.pipeline_mode<synchronous>, transform_indices = @transform_1, window_bounds = array<i64: 16, 32>}, {pipeline_mode = #tpu.pipeline_mode<synchronous>, transform_indices = @transform_2, window_bounds = array<i64: 2, 32, 16>}]} {
    %c0 = arith.constant 0 : index
    %c0_0 = arith.constant 0 : index
    %0 = vector.load %arg1[%c0, %c0_0] : memref<32x1xi32, #tpu.memory_space<vmem>>, vector<32x1xi32>
    %1 = tpu.iota {dimensions = array<i32: 1>} : vector<32x16xi32>
    %2 = vector.broadcast %0 : vector<32x1xi32> to vector<32x16xi32>
    %3 = arith.cmpi eq, %2, %1 : vector<32x16xi32>
    %4 = arith.extui %3 : vector<32x16xi1> to vector<32x16xi32>
    %5 = arith.sitofp %4 : vector<32x16xi32> to vector<32x16xf32>
    %c0_1 = arith.constant 0 : index
    %c0_2 = arith.constant 0 : index
    %6 = vector.load %arg2[%c0_1, %c0_2] : memref<16x32xf32, #tpu.memory_space<vmem>>, vector<16x32xf32>
    %cst = arith.constant dense<0.000000e+00> : vector<32x32xf32>
    %7 = tpu.matmul %5, %6, %cst {dimension_numbers = #tpu.dot_dimension_numbers<[1], [0], [0], [1], [0, 0, 1, 1], [], []>} : vector<32x16xf32>, vector<16x32xf32>, vector<32x32xf32> -> vector<32x32xf32>
    %8 = vector.extract_strided_slice %7 {offsets = [0, 0], sizes = [16, 32], strides = [1, 1]} : vector<32x32xf32> to vector<16x32xf32>
    %9 = tpu.transpose %8, [1, 0] : vector<16x32xf32> -> vector<32x16xf32>
    %c0_3 = arith.constant 0 : index
    %c0_4 = arith.constant 0 : index
    %c0_5 = arith.constant 0 : index
    %10 = vector.load %arg3[%c0_3, %c0_4, %c0_5] : memref<2x32x16xf32, #tpu.memory_space<vmem>>, vector<1x32x16xf32>
    %11 = vector.shape_cast %10 : vector<1x32x16xf32> to vector<32x16xf32>
    %12 = vector.shape_cast %9 : vector<32x16xf32> to vector<1x32x16xf32>
    tpu.vector_store %arg3[%c0_3, %c0_4, %c0_5], %12 {strides = array<i32>} : memref<2x32x16xf32, #tpu.memory_space<vmem>>, vector<1x32x16xf32>,
    %13 = vector.extract_strided_slice %7 {offsets = [16, 0], sizes = [16, 32], strides = [1, 1]} : vector<32x32xf32> to vector<16x32xf32>
    %14 = tpu.transpose %13, [1, 0] : vector<16x32xf32> -> vector<32x16xf32>
    %c1 = arith.constant 1 : index
    %c0_6 = arith.constant 0 : index
    %c0_7 = arith.constant 0 : index
    %15 = vector.load %arg3[%c1, %c0_6, %c0_7] : memref<2x32x16xf32, #tpu.memory_space<vmem>>, vector<1x32x16xf32>
    %16 = vector.shape_cast %15 : vector<1x32x16xf32> to vector<32x16xf32>
    %17 = vector.shape_cast %14 : vector<32x16xf32> to vector<1x32x16xf32>
    tpu.vector_store %arg3[%c1, %c0_6, %c0_7], %17 {strides = array<i32>} : memref<2x32x16xf32, #tpu.memory_space<vmem>>, vector<1x32x16xf32>,
    return
  }
  func.func @transform_0(%arg0: i32) -> (i32, i32) {
    %c0_i32 = arith.constant 0 : i32
    %c0_i32_0 = arith.constant 0 : i32
    %c0_i32_1 = arith.constant 0 : i32
    return %c0_i32, %c0_i32_0 : i32, i32
  }
  func.func @transform_1(%arg0: i32) -> (i32, i32) {
    %c0_i32 = arith.constant 0 : i32
    %c0_i32_0 = arith.constant 0 : i32
    %c0_i32_1 = arith.constant 0 : i32
    return %c0_i32, %c0_i32_0 : i32, i32
  }
  func.func @transform_2(%arg0: i32) -> (i32, i32, i32) {
    %c0_i32 = arith.constant 0 : i32
    %c0_i32_0 = arith.constant 0 : i32
    %c0_i32_1 = arith.constant 0 : i32
    %c0_i32_2 = arith.constant 0 : i32
    return %c0_i32, %c0_i32_0, %c0_i32_1 : i32, i32, i32
  }
}

</mosaic_0001>

<bundles_post_ra>
// kernel: tpu_custom_call.1
= control target key start
LH: loop header
LB: loop body
LE: loop exit
PB: predicated region body
PF: predicated region fallthrough
CT: control target
= control target key end

     0   :  { %v254_v0 = vmov 0   ;;  %v15_v7 = vlaneseq  ;;  %vm43_vm0 = vcmask 130048   ;;  %v255_v11 = vmov 0.0   ;;  %s325_s0 = inlined_call_operand.vmem [shape: s32[32,1], index: 0, kind: input, shape index: {}]   ;;  %s326_s1 = inlined_call_operand.vmem [shape: f32[16,32], index: 1, kind: input, shape index: {}]   ;;  %s327_s2 = inlined_call_operand.vmem [shape: f32[2,32,16], index: 2, kind: output, shape index: {}]  }
   0x1   :  { %253 = vset.pattern.permute.xlu1 %v254_v0  ;;  %252 = vset.pattern.permute.xlu0 %v254_v0  ;;  %v12_v1 = vld [vmem:[%s325_s0 + $0x8] sm:$0xff]  ;;  %v11_v2 = vld [vmem:[%s325_s0] sm:$0xff]  ;;  %v14_v5 = vld [vmem:[%s325_s0 + $0x18] sm:$0xff] }
   0x2   :  { %21 = vperm.xlu1 %253, %v12_v1   ;;  %18 = vperm.xlu0 %252, %v11_v2   ;;  %v42_v3 = vld [vmem:[%s326_s1 + $0x8] sm:$0xff]  ;;  %v41_v4 = vld [vmem:[%s326_s1] sm:$0xff]  ;;  %v13_v6 = vld [vmem:[%s325_s0 + $0x10] sm:$0xff]  ;;  %v16_v8 = vand.u32 127, %v15_v7 }
   0x3   :  { %236 = vmatprep.subr.mxu0 %v42_v3  ;;  %246 = vmatprep.subr.mxu1 %v42_v3 }
   0x4   :  { %237 = vmatpush3.msra.mxu0 %v42_v3  ;;  %248 = vmatpush3.msra.mxu1 %v42_v3 }
   0x5   :  { %238 = vmatprep.subr.mxu0 %v41_v4  ;;  %247 = vmatprep.subr.mxu1 %v41_v4 }
   0x6   :  { %27 = vperm.xlu1 %253, %v14_v5   ;;  %24 = vperm.xlu0 %252, %v13_v6  }
   0x7   :  { %239 = vmatpush3.msra.mxu0 %v41_v4  ;;  %249 = vmatpush3.msra.mxu1 %v41_v4 }
  0x7d   :  { %v22_v9 = vpop.permute.xlu1 %21  ;;  %v19_v10 = vpop.permute.xlu0 %18 }
  0x7e   :  { %vm30_vm1 = vcmp.eq.s32.totalorder %v22_v9, %v16_v8  ;;  %vm29_vm2 = vcmp.eq.s32.totalorder %v19_v10, %v16_v8 }
  0x7f   :  { %v219_v12 = vsel %vm30_vm1, 1.0, %v255_v11  ;;  %v218_v13 = vsel %vm29_vm2, 1.0, %v255_v11 }
  0x80   :  { %240 = vmatprep.mubr.msk.f32.mxu0 %vm43_vm0, %v218_v13 }
  0x81   :  { %v28_v14 = vpop.permute.xlu1 %27  ;;  %241 = vmatmul.mubr.msk.f32.vlgmr.msra.gmra.mxu0 %vm43_vm0, %v219_v12  ;;  %v25_v15 = vpop.permute.xlu0 %24 }
  0x82   :  { %vm32_vm3 = vcmp.eq.s32.totalorder %v28_v14, %v16_v8  ;;  %vm31_vm4 = vcmp.eq.s32.totalorder %v25_v15, %v16_v8 }
  0x83   :  { %v221_v16 = vsel %vm32_vm3, 1.0, %v255_v11  ;;  %v220_v17 = vsel %vm31_vm4, 1.0, %v255_v11 }
  0x84   :  { %243 = vmatprep.mubr.msk.f32.mxu1 %vm43_vm0, %v220_v17 }
  0x85   :  { %244 = vmatmul.mubr.msk.f32.vlgmr.msra.gmra.mxu1 %vm43_vm0, %v221_v16 }
 0x141   :  { %v242_v18 = vpop.f32.mrf.mxu0 }
 0x143   :  { %v122_v19 = vpop.f32.mrf.mxu0 }
 0x144   :  { %141 = vxpose.xlu0.b32.start [1/2] (short) (narrow) %v122_v19, 32 }
 0x145   :  { %v245_v20 = vpop.f32.mrf.mxu1 }
 0x147   :  { %v132_v21 = vpop.f32.mrf.mxu1 }
 0x148   :  { %142 = vxpose.xlu0.b32.end [2/2] (short) (narrow) %v242_v18, 32  ;;  %177 = vxpose.xlu1.b32.start [1/2] (short) (narrow) %v132_v21, 32 }
 0x14c   :  { %178 = vxpose.xlu1.b32.end [2/2] (short) (narrow) %v245_v20, 32 }
 0x1c0   :  { %v157_v22 = vpop.trf.xlu0 }
 0x1c1   :  { %173 = vst.msk [vmem:[%s327_s2] sm:$0xff] %vm43_vm0, %v157_v22 }
 0x1c4   :  { %v193_v23 = vpop.trf.xlu1  ;;  %v158_v24 = vpop.trf.xlu0 }
 0x1c5   :  { %226 = vst.msk [vmem:[%s327_s2 + $0x20] sm:$0xff] %vm43_vm0, %v193_v23  ;;  %174 = vst.msk [vmem:[%s327_s2 + $0x8] sm:$0xff] %vm43_vm0, %v158_v24 }
 0x1c8   :  { %v194_v25 = vpop.trf.xlu1  ;;  %v159_v26 = vpop.trf.xlu0 }
 0x1c9   :  { %227 = vst.msk [vmem:[%s327_s2 + $0x28] sm:$0xff] %vm43_vm0, %v194_v25  ;;  %175 = vst.msk [vmem:[%s327_s2 + $0x10] sm:$0xff] %vm43_vm0, %v159_v26 }
 0x1cc   :  { %v195_v27 = vpop.trf.xlu1  ;;  %v160_v28 = vpop.trf.xlu0 }
 0x1cd   :  { %228 = vst.msk [vmem:[%s327_s2 + $0x30] sm:$0xff] %vm43_vm0, %v195_v27  ;;  %176 = vst.msk [vmem:[%s327_s2 + $0x18] sm:$0xff] %vm43_vm0, %v160_v28 }
 0x1d0   :  { %v196_v29 = vpop.trf.xlu1 }
 0x1d1   :  { %229 = vst.msk [vmem:[%s327_s2 + $0x38] sm:$0xff] %vm43_vm0, %v196_v29 }

</bundles_post_ra>
